<compile_context>
chip_gen: v7x
topology: tpu7x:2x2x1
jax: 0.10.0
libtpu: 0.0.40
codegen_flags: <defaults>
</compile_context>

<pallas_src>
import math

import jax
import jax.numpy as jnp
from jax.experimental import pallas as pl
from jax.experimental.pallas import tpu as pltpu

_LANES = 128
_SUBLANES = 8
_TARGET_TILE_BYTES = 4 << 20      # ~4 MiB of streamed HBM bytes per grid step


def _round_up(a: int, m: int) -> int:
    return ((a + m - 1) // m) * m


def _choose_tile(num_rows: int, row_vmem_bytes: int, max_rows=None) -> int:
    """Packed-input rows per grid step (sized from lane-padded VMEM bytes)."""
    tile = max(_SUBLANES,
               (_TARGET_TILE_BYTES // max(row_vmem_bytes, 1))
               // _SUBLANES * _SUBLANES)
    if max_rows is not None:
        tile = min(tile, max(_SUBLANES, _round_up(max_rows, _SUBLANES)))
    if num_rows <= tile:
        # Single block covering the whole array exactly: always a legal block
        # shape (block dim == full array dim), no overhang / masking needed.
        return num_rows
    # Keep >= 4 grid steps when tiling so a 2-TensorCore part (v7x) gets at
    # least 2 double-buffered steps per core from the "parallel" batch axis.
    if pl.cdiv(num_rows, tile) < 4:
        tile = min(tile, _round_up(pl.cdiv(num_rows, 4), _SUBLANES))
    return tile


def _linreg_kernel(xp_ref, wbd_ref, b_ref, o_ref):
    # xp_ref : (TB, pack*F) packed x tile; row r, lanes [j*F:(j+1)*F] hold
    #          original row pack*r + j.
    # wbd_ref: (pack*F, pack) block-diagonal weight, resident across steps.
    # b_ref  : (1, 1) SMEM scalar bias.
    # o_ref  : (TB, pack) output tile; o[r, j] = y[pack*r + j].
    y = jnp.dot(
        xp_ref[...], wbd_ref[...],
        preferred_element_type=jnp.float32,
        precision=jax.lax.Precision.HIGHEST,   # keep the f32 MXU matmul accurate
    )
    o_ref[...] = y + b_ref[0, 0]


def linear_regression_forward(x, weight, bias, *, max_tile_rows=None):
    """Pallas forward for linearRegression: y = x @ W.T + b.

    x:      (B, F) float32
    weight: (1, F) float32   (nn.Linear weight, out_features=1)
    bias:   (1,)   float32
    returns (B, 1) float32
    """
    x = jnp.asarray(x, jnp.float32)
    B, F = x.shape
    w = jnp.asarray(weight, jnp.float32).reshape(1, F)
    b2d = jnp.asarray(bias, jnp.float32).reshape(1, 1)

    # Lane-packing factor: `pack` original rows per 128-lane VMEM row.
    pack = _LANES // F if (F <= _LANES and _LANES % F == 0) else 1
    Fp = pack * F

    # The packed view needs B % pack == 0.  Pad only to a multiple of `pack`
    # (never to the tile size); this copy triggers only when B % pack != 0.
    B_eff = _round_up(B, pack)
    if B_eff != B:
        x = jnp.pad(x, ((0, B_eff - B), (0, 0)))
    rows = B_eff // pack
    # Free (layout-preserving, row-major) reshape: no HBM copy.
    xp = x.reshape(rows, Fp)

    # (Fp, pack) block-diagonal weight: column j holds w for packed slot j.
    w_bd = (jnp.eye(pack, dtype=jnp.float32)[:, None, :]
            * w.reshape(1, F, 1)).reshape(Fp, pack)

    # ---- tiling / VMEM budget (footprint-derived, generation-safe) ---------
    row_vmem = _round_up(Fp, _LANES) * 4          # lane-padded bytes per row
    tile = _choose_tile(rows, row_vmem, max_tile_rows)
    num_tiles = pl.cdiv(rows, tile)

    tile8 = _round_up(tile, _SUBLANES)
    in_vmem = tile8 * row_vmem                                  # streamed x tile
    out_vmem = tile8 * _round_up(pack, _LANES) * 4              # (tile, pack) out
    w_vmem = _round_up(Fp, _SUBLANES) * _round_up(pack, _LANES) * 4
    vmem_limit = 2 * (in_vmem + out_vmem + w_vmem) + (2 << 20)  # 2x: double buffers
    vmem_limit = int(min(max(vmem_limit, 8 << 20), 48 << 20))

    cost = pl.CostEstimate(
        flops=2 * rows * Fp * pack,
        transcendentals=0,
        bytes_accessed=4 * (rows * Fp + Fp * pack + rows * pack),
    )

    out = pl.pallas_call(
        _linreg_kernel,
        out_shape=jax.ShapeDtypeStruct((rows, pack), jnp.float32),
        grid=(num_tiles,),
        in_specs=[
            pl.BlockSpec((tile, Fp), lambda i: (i, 0)),          # streamed x tiles
            pl.BlockSpec((Fp, pack), lambda i: (0, 0)),          # resident weight
            pl.BlockSpec(memory_space=pltpu.MemorySpace.SMEM),   # scalar bias
        ],
        out_specs=pl.BlockSpec((tile, pack), lambda i: (i, 0)),
        compiler_params=pltpu.CompilerParams(
            dimension_semantics=("parallel",),    # megacore-shard batch tiles
            vmem_limit_bytes=vmem_limit,
        ),
        cost_estimate=cost,
    )(xp, w_bd, b2d)

    # Row-major flatten of (rows, pack) restores original row order; crop the
    # pack-padding and return (B, 1).
    return out.reshape(-1)[:B].reshape(B, 1)


if __name__ == "__main__":
    # Small deterministic example consistent with the module: n_features=32.
    B, F = 8, 32
    key = jax.random.PRNGKey(0)
    kx, kw, kb = jax.random.split(key, 3)

    x = jax.random.normal(kx, (B, F), dtype=jnp.float32)

    # nn.Linear default init: U(-1/sqrt(F), 1/sqrt(F)).
    bound = 1.0 / math.sqrt(F)
    weight = jax.random.uniform(kw, (1, F), minval=-bound, maxval=bound,
                                dtype=jnp.float32)
    bias = jax.random.uniform(kb, (1,), minval=-bound, maxval=bound,
                              dtype=jnp.float32)

    def ref_fn(xv):
        # Elementwise f32 reference (independent of XLA matmul precision).
        return jnp.sum(xv * weight, axis=-1, keepdims=True) + bias

    out = jax.block_until_ready(linear_regression_forward(x, weight, bias))
    assert out.shape == (B, 1)
    # Tolerance leaves room for MXU pass decomposition across generations;
    # with precision=HIGHEST the observed error is ~1e-6.
    assert jnp.allclose(out, ref_fn(x), atol=5e-3, rtol=5e-3)

    # Ragged batch (B % 4 != 0 -> pad-to-pack path) plus a forced small tile so
    # the multi-step grid and masked partial final block are exercised.
    B2 = 1003
    x2 = jax.random.normal(kx, (B2, F), dtype=jnp.float32)
    out2 = jax.block_until_ready(
        linear_regression_forward(x2, weight, bias, max_tile_rows=64))
    assert out2.shape == (B2, 1)
    assert jnp.allclose(out2, ref_fn(x2), atol=5e-3, rtol=5e-3)

    print("KERNEL_OK")
</pallas_src>

<mosaic_0001>
module attributes {stable_mosaic.version = 11 : i64} {
  func.func @_linreg_kernel(%arg0: i32, %arg1: memref<2x128xf32, #tpu.memory_space<vmem>>, %arg2: memref<128x4xf32, #tpu.memory_space<vmem>>, %arg3: memref<1x1xf32, #tpu.memory_space<smem>>, %arg4: memref<2x4xf32, #tpu.memory_space<vmem>>) attributes {dimension_semantics = [#tpu.dimension_semantics<parallel>], iteration_bounds = array<i64: 1>, scalar_prefetch = 0 : i64, scratch_operands = 0 : i64, tpu.core_type = #tpu.core_type<tc>, window_params = [{transform_indices = @transform_0, window_bounds = array<i64: 2, 128>}, {pipeline_mode = #tpu.pipeline_mode<synchronous>, transform_indices = @transform_1, window_bounds = array<i64: 128, 4>}, {transform_indices = @transform_2, window_bounds = array<i64: 1, 1>}, {transform_indices = @transform_3, window_bounds = array<i64: 2, 4>}]} {
    %c0 = arith.constant 0 : index
    %c0_0 = arith.constant 0 : index
    %0 = vector.load %arg1[%c0, %c0_0] : memref<2x128xf32, #tpu.memory_space<vmem>>, vector<2x128xf32>
    %c0_1 = arith.constant 0 : index
    %c0_2 = arith.constant 0 : index
    %1 = vector.load %arg2[%c0_1, %c0_2] : memref<128x4xf32, #tpu.memory_space<vmem>>, vector<128x4xf32>
    %cst = arith.constant dense<0.000000e+00> : vector<2x4xf32>
    %2 = tpu.matmul %0, %1, %cst {dimension_numbers = #tpu.dot_dimension_numbers<[1], [0], [0], [1], [0, 0, 1, 1], [], []>, precision = #tpu.contract_precision<fp32>} : vector<2x128xf32>, vector<128x4xf32>, vector<2x4xf32> -> vector<2x4xf32>
    %c0_3 = arith.constant 0 : index
    %c0_4 = arith.constant 0 : index
    %3 = memref.load %arg3[%c0_3, %c0_4] : memref<1x1xf32, #tpu.memory_space<smem>>
    %4 = vector.broadcast %3 : f32 to vector<2x4xf32>
    %5 = arith.addf %2, %4 : vector<2x4xf32>
    %c0_5 = arith.constant 0 : index
    %c0_6 = arith.constant 0 : index
    %6 = vector.load %arg4[%c0_5, %c0_6] : memref<2x4xf32, #tpu.memory_space<vmem>>, vector<2x4xf32>
    tpu.vector_store %arg4[%c0_5, %c0_6], %5 {strides = array<i32>} : memref<2x4xf32, #tpu.memory_space<vmem>>, vector<2x4xf32>,
    return
  }
  func.func @transform_0(%arg0: i32) -> (i32, i32) {
    %c0_i32 = arith.constant 0 : i32
    %c0_i32_0 = arith.constant 0 : i32
    return %arg0, %c0_i32 : i32, i32
  }
  func.func @transform_1(%arg0: i32) -> (i32, i32) {
    %c0_i32 = arith.constant 0 : i32
    %c0_i32_0 = arith.constant 0 : i32
    %c0_i32_1 = arith.constant 0 : i32
    return %c0_i32, %c0_i32_0 : i32, i32
  }
  func.func @transform_2(%arg0: i32) -> (i32, i32) {
    %c0_i32 = arith.constant 0 : i32
    %c0_i32_0 = arith.constant 0 : i32
    %c0_i32_1 = arith.constant 0 : i32
    return %c0_i32, %c0_i32_0 : i32, i32
  }
  func.func @transform_3(%arg0: i32) -> (i32, i32) {
    %c0_i32 = arith.constant 0 : i32
    %c0_i32_0 = arith.constant 0 : i32
    return %arg0, %c0_i32 : i32, i32
  }
}

</mosaic_0001>

<bundles_post_ra>
// kernel: tpu_custom_call.1
= control target key start
LH: loop header
LB: loop body
LE: loop exit
PB: predicated region body
PF: predicated region fallthrough
CT: control target
= control target key end

     0   :  { %v1186_v3 = vmov 0.0|0.0   ;;  %vm1187_vm0 = vmmov 0   ;;  %v1188_v11 = vmov 0.0   ;;  %s1523_s0 = inlined_call_operand.vmem [shape: f32[2,128], index: 0, kind: input, shape index: {}]   ;;  %s1524_s1 = inlined_call_operand.vmem [shape: f32[128,4], index: 1, kind: input, shape index: {}]   ;;  %s1525_s2 = inlined_call_operand.<no memory space> [shape: f32[1,1], index: 2, kind: input, shape index: {}]   ;;  %s1526_s3 = inlined_call_operand.hbm [shape: f32[2,4], index: 3, kind: output, shape index: {}]  }
   0x1   :  { %v17_v0 = vld [vmem:[%s1524_s1] sm:$0xff]  ;;  %v18_v1 = vld [vmem:[%s1524_s1 + $0x8] sm:$0xff]  ;;  %v19_v2 = vld [vmem:[%s1524_s1 + $0x10] sm:$0xff]  ;;  %1004 = vmatprep.subr.bf16.mxu1 %v1186_v3  ;;  %1076 = vmatprep.subr.bf16.mxu0 %v1186_v3 }
   0x2   :  { %v36_v4 = vand.u32 4294901760, %v17_v0  ;;  %v39_v5 = vand.u32 4294901760, %v18_v1  ;;  %v20_v6 = vld [vmem:[%s1524_s1 + $0x18] sm:$0xff]  ;;  %v42_v7 = vand.u32 4294901760, %v19_v2  ;;  %v21_v9 = vld [vmem:[%s1524_s1 + $0x20] sm:$0xff]  ;;  %v22_v10 = vld [vmem:[%s1524_s1 + $0x28] sm:$0xff]  ;;  %826 = vmatprep.mubr.msk.f32.mxu1 %vm1187_vm0, %v1188_v11  ;;  %931 = vmatprep.mubr.msk.f32.mxu0 %vm1187_vm0, %v1188_v11 }
   0x3   :  { %v45_v8 = vand.u32 4294901760, %v20_v6  ;;  %v48_v14 = vand.u32 4294901760, %v21_v9  ;;  %v51_v15 = vand.u32 4294901760, %v22_v10  ;;  %v23_v16 = vld [vmem:[%s1524_s1 + $0x30] sm:$0xff]  ;;  %v24_v17 = vld [vmem:[%s1524_s1 + $0x38] sm:$0xff] }
   0x4   :  { %v1234_v12 = vpack.c.bf16 %v39_v5, %v36_v4 }
   0x5   :  { %v1238_v13 = vpack.c.bf16 %v45_v8, %v42_v7 }
   0x6   :  { %1006 = vmatpush3.bf16.msra.mxu1 %v1234_v12  ;;  %1078 = vmatpush3.bf16.msra.mxu0 %v1234_v12 }
   0x7   :  { %1007 = vmatprep.subr.bf16.mxu1 %v1186_v3  ;;  %1079 = vmatprep.subr.bf16.mxu0 %v1186_v3 }
   0x8   :  { %9 = vsyncpa [#allocation4], 0  ;;  %v1250_v18 = vpack.c.bf16 %v51_v15, %v48_v14  ;;  %v54_v19 = vand.u32 4294901760, %v23_v16  ;;  %v57_v20 = vand.u32 4294901760, %v24_v17  ;;  %v1257_v21 = vld [vmem:[%s1524_s1 + $0x40] sm:$0xff]  ;;  %v1262_v22 = vld [vmem:[%s1524_s1 + $0x48] sm:$0xff]  ;;  %v1285_v29 = vsub.f32 %v17_v0, %v36_v4 }
   0x9   :  { %v60_v24 = vand.u32 4294901760, %v1257_v21  ;;  %v63_v25 = vand.u32 4294901760, %v1262_v22  ;;  %v16_v26 = vld [vmem:[%s1523_s0] sm:$0x3]  ;;  %v1278_v27 = vld [vmem:[%s1524_s1 + $0x50] sm:$0xff]  ;;  %v1283_v28 = vld [vmem:[%s1524_s1 + $0x58] sm:$0xff]  ;;  %v1289_v31 = vsub.f32 %v18_v1, %v39_v5  ;;  %v1309_v37 = vsub.f32 %v19_v2, %v42_v7 }
   0xa   :  { %1009 = vmatpush3.bf16.msra.mxu1 %v1238_v13  ;;  %1081 = vmatpush3.bf16.msra.mxu0 %v1238_v13  ;;  %v1266_v23 = vpack.c.bf16 %v57_v20, %v54_v19  ;;  %v1287_v30 = vand.u32 4294901760, %v16_v26  ;;  %v66_v33 = vand.u32 4294901760, %v1278_v27  ;;  %v69_v34 = vand.u32 4294901760, %v1283_v28  ;;  %v1300_v35 = vld [vmem:[%s1524_s1 + $0x60] sm:$0xff]  ;;  %v1307_v36 = vld [vmem:[%s1524_s1 + $0x68] sm:$0xff]  ;;  %v1329_v43 = vld [vmem:[%s1524_s1 + $0x70] sm:$0xff] }
   0xb   :  { %1010 = vmatprep.subr.bf16.mxu1 %v1186_v3  ;;  %1082 = vmatprep.subr.bf16.mxu0 %v1186_v3  ;;  %v1293_v32 = vpack.c.bf16 %v63_v25, %v60_v24  ;;  %v1311_v38 = vsub.f32 %v20_v6, %v45_v8  ;;  %v72_v39 = vand.u32 4294901760, %v1300_v35  ;;  %v75_v42 = vand.u32 4294901760, %v1307_v36  ;;  %v1334_v44 = vld [vmem:[%s1524_s1 + $0x78] sm:$0xff]  ;;  %s1189_s19 = smov [#allocation3]  }
   0xc   :  { %v1315_v40 = vsub.f32 %v16_v26, %v1287_v30  ;;  %v1323_v41 = vpack.c.bf16 %v69_v34, %v66_v33  ;;  %v129_v45 = vand.u32 4294901760, %v1285_v29  ;;  %v136_v46 = vand.u32 4294901760, %v1289_v31  ;;  %s684_s20 = sshll.u32 %s1189_s19, 4  ;;  %s685_s20 = int_to_ptr.vmem [resolvable:$true] %s684_s20 }
   0xd   :  { %v1340_v47 = vsub.f32 %v21_v9, %v48_v14  ;;  %v1342_v48 = vsub.f32 %v22_v10, %v51_v15  ;;  %v78_v49 = vand.u32 4294901760, %v1329_v43  ;;  %v81_v50 = vand.u32 4294901760, %v1334_v44  ;;  %s1162_s21 = scalar_lea.vmem %s685_s20, 32  ;;  %p1167_p1 = scmp.lt.s32.totalorder %s685_s20, %s685_s20 }
   0xe   :  { %1012 = vmatpush3.bf16.msra.mxu1 %v1250_v18  ;;  %1084 = vmatpush3.bf16.msra.mxu0 %v1250_v18  ;;  %v118_v51 = vand.u32 4294901760, %v1315_v40  ;;  %v143_v52 = vand.u32 4294901760, %v1309_v37  ;;  %v1354_v53 = vpack.c.bf16 %v75_v42, %v72_v39  ;;  %v130_v54 = vsub.f32 %v1285_v29, %v129_v45  ;;  %p1163_p0 = scmp.ne.s32.totalorder %s685_s20, %s1162_s21  ;;  %p1168_p2 = scmp.lt.s32.totalorder %s1162_s21, %s1162_s21 }
   0xf   :  { %1013 = vmatprep.subr.bf16.mxu1 %v1186_v3  ;;  %1085 = vmatprep.subr.bf16.mxu0 %v1186_v3  ;;  %v137_v55 = vsub.f32 %v1289_v31, %v136_v46  ;;  %v150_v56 = vand.u32 4294901760, %v1311_v38  ;;  %v1361_v57 = vsub.f32 %v23_v16, %v54_v19  ;;  %v1363_v58 = vsub.f32 %v24_v17, %v57_v20 }
  0x10   :  { %v119_v59 = vsub.f32 %v1315_v40, %v118_v51  ;;  %v144_v60 = vsub.f32 %v1309_v37, %v143_v52  ;;  %v157_v61 = vand.u32 4294901760, %v1340_v47  ;;  %v164_v62 = vand.u32 4294901760, %v1342_v48  ;;  %p1169_p3 = por %p1168_p2, %p1167_p1 }
  0x11   :  { %v1375_v63 = vpack.c.bf16 %v81_v50, %v78_v49  ;;  %v131_v0 = vand.u32 4294901760, %v130_v54  ;;  %v138_v1 = vand.u32 4294901760, %v137_v55  ;;  %v151_v2 = vsub.f32 %v1311_v38, %v150_v56 }
  0x12   :  { %1015 = vmatpush3.bf16.msra.mxu1 %v1266_v23  ;;  %1087 = vmatpush3.bf16.msra.mxu0 %v1266_v23  ;;  %v1381_v4 = vsub.f32 %v1257_v21, %v60_v24  ;;  %v1384_v5 = vsub.f32 %v1262_v22, %v63_v25  ;;  %v1101_v6 = vpack.c.bf16 %v136_v46, %v129_v45  ;;  %v120_v7 = vand.u32 4294901760, %v119_v59  ;;  %p1170_p4 = pnand %p1169_p3, %p1163_p0 }
  0x13   :  { %1016 = vmatprep.subr.bf16.mxu1 %v1186_v3  ;;  %1088 = vmatprep.subr.bf16.mxu0 %v1186_v3  ;;  %v145_v8 = vand.u32 4294901760, %v144_v60  ;;  %v158_v9 = vsub.f32 %v1340_v47, %v157_v61  ;;  %v165_v10 = vsub.f32 %v1342_v48, %v164_v62  ;;  %v1029_v14 = vpack.c.bf16 %v138_v1, %v131_v0 }
  0x14   :  { %v152_v15 = vand.u32 4294901760, %v151_v2  ;;  %v171_v16 = vand.u32 4294901760, %v1361_v57  ;;  %v178_v17 = vand.u32 4294901760, %v1363_v58  ;;  %v1397_v19 = vsub.f32 %v1278_v27, %v66_v33 }
  0x15   :  { %v1402_v20 = vsub.f32 %v1283_v28, %v69_v34  ;;  %v1104_v21 = vpack.c.bf16 %v150_v56, %v143_v52  ;;  %v159_v22 = vand.u32 4294901760, %v158_v9  ;;  %v166_v24 = vand.u32 4294901760, %v165_v10 }
  0x16   :  { %1018 = vmatpush3.bf16.msra.mxu1 %v1293_v32  ;;  %1090 = vmatpush3.bf16.msra.mxu0 %v1293_v32  ;;  %v185_v25 = vand.u32 4294901760, %v1381_v4  ;;  %v1032_v26 = vpack.c.bf16 %v152_v15, %v145_v8  ;;  %v172_v45 = vsub.f32 %v1361_v57, %v171_v16  ;;  %v179_v27 = vsub.f32 %v1363_v58, %v178_v17 }
  0x17   :  { %1019 = vmatprep.subr.bf16.mxu1 %v1186_v3  ;;  %1091 = vmatprep.subr.bf16.mxu0 %v1186_v3  ;;  %v192_v33 = vand.u32 4294901760, %v1384_v5  ;;  %v1413_v28 = vsub.f32 %v1300_v35, %v72_v39  ;;  %v1418_v34 = vsub.f32 %v1307_v36, %v75_v42  ;;  %v1035_v46 = vpack.c.bf16 %v166_v24, %v159_v22 }
  0x18   :  { %v186_v52 = vsub.f32 %v1381_v4, %v185_v25  ;;  %v199_v54 = vand.u32 4294901760, %v1397_v19  ;;  %v173_v35 = vand.u32 4294901760, %v172_v45  ;;  %v180_v39 = vand.u32 4294901760, %v179_v27 }
  0x19   :  { %v193_v55 = vsub.f32 %v1384_v5, %v192_v33  ;;  %v206_v36 = vand.u32 4294901760, %v1402_v20  ;;  %v1433_v42 = vsub.f32 %v1329_v43, %v78_v49  ;;  %v1438_v56 = vsub.f32 %v1334_v44, %v81_v50 }
  0x1a   :  { %1021 = vmatpush3.bf16.msra.mxu1 %v1323_v41  ;;  %1093 = vmatpush3.bf16.msra.mxu0 %v1323_v41  ;;  %v1110_v59 = vpack.c.bf16 %v178_v17, %v171_v16  ;;  %v187_v60 = vand.u32 4294901760, %v186_v52  ;;  %v1038_v0 = vpack.c.bf16 %v180_v39, %v173_v35  ;;  %v220_v43 = vand.u32 4294901760, %v1418_v34 }
  0x1b   :  { %1022 = vmatprep.subr.bf16.mxu1 %v1186_v3  ;;  %1094 = vmatprep.subr.bf16.mxu0 %v1186_v3  ;;  %v194_v1 = vand.u32 4294901760, %v193_v55  ;;  %v207_v2 = vsub.f32 %v1402_v20, %v206_v36  ;;  %v1113_v44 = vpack.c.bf16 %v192_v33, %v185_v25  ;;  %v234_v10 = vand.u32 4294901760, %v1438_v56 }
  0x1c   :  { %v221_v9 = vsub.f32 %v1418_v34, %v220_v43  ;;  %vm676_vm1 = vcmask 25600  }
  0x1d   :  { %v208_v8 = vand.u32 4294901760, %v207_v2  ;;  %v235_v22 = vsub.f32 %v1438_v56, %v234_v10 }
  0x1e   :  { %1024 = vmatpush3.bf16.msra.mxu1 %v1354_v53  ;;  %1096 = vmatpush3.bf16.msra.mxu0 %v1354_v53  ;;  %v222_v17 = vand.u32 4294901760, %v221_v9 }
  0x1f   :  { %1025 = vmatprep.subr.bf16.mxu1 %v1186_v3  ;;  %1097 = vmatprep.subr.bf16.mxu0 %v1186_v3  ;;  %v236_v45 = vand.u32 4294901760, %v235_v22 }
  0x22   :  { %1027 = vmatpush3.bf16.msra.mxu1 %v1375_v63  ;;  %1099 = vmatpush3.bf16.msra.mxu0 %v1375_v63 }
  0x23   :  { %1028 = vmatprep.subr.bf16.mxu1 %v1186_v3  ;;  %1100 = vmatprep.subr.bf16.mxu0 %v1186_v3 }
  0x25   :  { %827 = vmatmul.mubr.f32.vlgmr.msra.gmra.mrb[0].mxu1 %v120_v7  ;;  %932 = vmatmul.mubr.f32.vlgmr.msra.gmra.mrb[0].mxu0 %v118_v51  ;;  %v1107_v51 = vpack.c.bf16 %v164_v62, %v157_v61  ;;  %v200_v61 = vsub.f32 %v1397_v19, %v199_v54  ;;  %v213_v62 = vand.u32 4294901760, %v1413_v28  ;;  %v1041_v7 = vpack.c.bf16 %v194_v1, %v187_v60 }
  0x26   :  { %1030 = vmatpush3.bf16.msra.mxu1 %v1029_v14  ;;  %1102 = vmatpush3.bf16.msra.mxu0 %v1101_v6  ;;  %v227_v6 = vand.u32 4294901760, %v1433_v42  ;;  %v1116_v14 = vpack.c.bf16 %v206_v36, %v199_v54 }
  0x27   :  { %1031 = vmatprep.subr.bf16.mxu1 %v1186_v3  ;;  %1103 = vmatprep.subr.bf16.mxu0 %v1186_v3  ;;  %v201_v49 = vand.u32 4294901760, %v200_v61  ;;  %v214_v50 = vsub.f32 %v1413_v28, %v213_v62  ;;  %v1119_v25 = vpack.c.bf16 %v220_v43, %v213_v62 }
  0x28   :  { %861 = vmatprep.mubr.msk.f32.mxu1 %vm1187_vm0, %v1188_v11  ;;  %966 = vmatprep.mubr.msk.f32.mxu0 %vm1187_vm0, %v1188_v11  ;;  %v1122_v33 = vpack.c.bf16 %v234_v10, %v227_v6 }
  0x29   :  { %v215_v15 = vand.u32 4294901760, %v214_v50  ;;  %v1044_v16 = vpack.c.bf16 %v208_v8, %v201_v49 }
  0x2a   :  { %1033 = vmatpush3.bf16.msra.mxu1 %v1032_v26  ;;  %1105 = vmatpush3.bf16.msra.mxu0 %v1104_v21  ;;  %v228_v21 = vsub.f32 %v1433_v42, %v227_v6 }
  0x2b   :  { %1034 = vmatprep.subr.bf16.mxu1 %v1186_v3  ;;  %1106 = vmatprep.subr.bf16.mxu0 %v1186_v3  ;;  %v1047_v24 = vpack.c.bf16 %v222_v17, %v215_v15 }
  0x2c   :  { %v229_v26 = vand.u32 4294901760, %v228_v21 }
  0x2e   :  { %1036 = vmatpush3.bf16.msra.mxu1 %v1035_v46  ;;  %1108 = vmatpush3.bf16.msra.mxu0 %v1107_v51  ;;  %v1050_v27 = vpack.c.bf16 %v236_v45, %v229_v26  ;;  %v1053_v46 = vpack.c.bf16 %v1289_v31, %v1285_v29  ;;  %v1056_v51 = vpack.c.bf16 %v1311_v38, %v1309_v37  ;;  %v34_v31 = vstv %s1525_s2 }
  0x2f   :  { %1037 = vmatprep.subr.bf16.mxu1 %v1186_v3  ;;  %1109 = vmatprep.subr.bf16.mxu0 %v1186_v3  ;;  %v1059_v29 = vpack.c.bf16 %v1342_v48, %v1340_v47 }
  0x32   :  { %1039 = vmatpush3.bf16.msra.mxu1 %v1038_v0  ;;  %1111 = vmatpush3.bf16.msra.mxu0 %v1110_v59 }
  0x33   :  { %1040 = vmatprep.subr.bf16.mxu1 %v1186_v3  ;;  %1112 = vmatprep.subr.bf16.mxu0 %v1186_v3 }
  0x36   :  { %1042 = vmatpush3.bf16.msra.mxu1 %v1041_v7  ;;  %1114 = vmatpush3.bf16.msra.mxu0 %v1113_v44 }
  0x37   :  { %1043 = vmatprep.subr.bf16.mxu1 %v1186_v3  ;;  %1115 = vmatprep.subr.bf16.mxu0 %v1186_v3 }
  0x3a   :  { %1045 = vmatpush3.bf16.msra.mxu1 %v1044_v16  ;;  %1117 = vmatpush3.bf16.msra.mxu0 %v1116_v14 }
  0x3b   :  { %1046 = vmatprep.subr.bf16.mxu1 %v1186_v3  ;;  %1118 = vmatprep.subr.bf16.mxu0 %v1186_v3 }
  0x3e   :  { %1048 = vmatpush3.bf16.msra.mxu1 %v1047_v24  ;;  %1120 = vmatpush3.bf16.msra.mxu0 %v1119_v25 }
  0x3f   :  { %1049 = vmatprep.subr.bf16.mxu1 %v1186_v3  ;;  %1121 = vmatprep.subr.bf16.mxu0 %v1186_v3 }
  0x42   :  { %1051 = vmatpush3.bf16.msra.mxu1 %v1050_v27  ;;  %1123 = vmatpush3.bf16.msra.mxu0 %v1122_v33 }
  0x43   :  { %1052 = vmatprep.subr.bf16.mxu1 %v1186_v3  ;;  %1124 = vmatprep.subr.bf16.mxu0 %v1186_v3 }
  0x45   :  { %862 = vmatmul.mubr.f32.vlgmr.msra.gmra.mrb[0].mxu1 %v1287_v30  ;;  %967 = vmatmul.mubr.f32.vlgmr.msra.gmra.mrb[0].mxu0 %v1287_v30 }
  0x46   :  { %1054 = vmatpush3.bf16.msra.mxu1 %v1053_v46  ;;  %1126 = vmatpush3.bf16.msra.mxu0 %v1234_v12  ;;  %v1062_v12 = vpack.c.bf16 %v1363_v58, %v1361_v57 }
  0x47   :  { %1055 = vmatprep.subr.bf16.mxu1 %v1186_v3  ;;  %1127 = vmatprep.subr.bf16.mxu0 %v1186_v3 }
  0x48   :  { %896 = vmatprep.mubr.msk.f32.mxu1 %vm1187_vm0, %v1188_v11  ;;  %1001 = vmatprep.mubr.msk.f32.mxu0 %vm1187_vm0, %v1188_v11  ;;  %v1065_v11 = vpack.c.bf16 %v1384_v5, %v1381_v4 }
  0x4a   :  { %1057 = vmatpush3.bf16.msra.mxu1 %v1056_v51  ;;  %1129 = vmatpush3.bf16.msra.mxu0 %v1238_v13  ;;  %v1068_v13 = vpack.c.bf16 %v1402_v20, %v1397_v19 }
  0x4b   :  { %1058 = vmatprep.subr.bf16.mxu1 %v1186_v3  ;;  %1130 = vmatprep.subr.bf16.mxu0 %v1186_v3 }
  0x4e   :  { %1060 = vmatpush3.bf16.msra.mxu1 %v1059_v29  ;;  %1132 = vmatpush3.bf16.msra.mxu0 %v1250_v18  ;;  %v1071_v18 = vpack.c.bf16 %v1418_v34, %v1413_v28 }
  0x4f   :  { %1061 = vmatprep.subr.bf16.mxu1 %v1186_v3  ;;  %1133 = vmatprep.subr.bf16.mxu0 %v1186_v3 }
  0x52   :  { %1063 = vmatpush3.bf16.msra.mxu1 %v1062_v12  ;;  %1135 = vmatpush3.bf16.msra.mxu0 %v1266_v23  ;;  %v1074_v23 = vpack.c.bf16 %v1438_v56, %v1433_v42 }
  0x53   :  { %1064 = vmatprep.subr.bf16.mxu1 %v1186_v3  ;;  %1136 = vmatprep.subr.bf16.mxu0 %v1186_v3 }
  0x56   :  { %1066 = vmatpush3.bf16.msra.mxu1 %v1065_v11  ;;  %1138 = vmatpush3.bf16.msra.mxu0 %v1293_v32 }
  0x57   :  { %1067 = vmatprep.subr.bf16.mxu1 %v1186_v3  ;;  %1139 = vmatprep.subr.bf16.mxu0 %v1186_v3 }
  0x5a   :  { %1069 = vmatpush3.bf16.msra.mxu1 %v1068_v13  ;;  %1141 = vmatpush3.bf16.msra.mxu0 %v1323_v41 }
  0x5b   :  { %1070 = vmatprep.subr.bf16.mxu1 %v1186_v3  ;;  %1142 = vmatprep.subr.bf16.mxu0 %v1186_v3 }
  0x5e   :  { %1072 = vmatpush3.bf16.msra.mxu1 %v1071_v18  ;;  %1144 = vmatpush3.bf16.msra.mxu0 %v1354_v53 }
  0x5f   :  { %1073 = vmatprep.subr.bf16.mxu1 %v1186_v3  ;;  %1145 = vmatprep.subr.bf16.mxu0 %v1186_v3 }
  0x62   :  { %1075 = vmatpush3.bf16.msra.mxu1 %v1074_v23  ;;  %1147 = vmatpush3.bf16.msra.mxu0 %v1375_v63 }
  0x65   :  { %897 = vmatmul.mubr.f32.vlgmr.msra.gmra.mrb[0].mxu1 %v1315_v40  ;;  %1002 = vmatmul.mubr.f32.vlgmr.msra.gmra.mrb[0].mxu0 %v1287_v30 }
 0x138   :  { %v377_v32 = vpop.f32.mrb[0].mxu1  ;;  %v672_v37 = vpop.f32.mrb[0].mxu0 }
 0x139   :  { %v1148_v38 = vadd.f32 %v377_v32, %v34_v31  ;;  %v898_v41 = vpop.f32.mrb[1].mxu1  ;;  %v1003_v47 = vpop.f32.mrb[1].mxu0 }
 0x13b   :  { %v1149_v3 = vadd.f32 %v1148_v38, %v672_v37 }
 0x13d   :  { %677 = vst.msk [vmem:[#allocation3] sm:$0x3] %vm676_vm1, %v1149_v3 }
 0x13e   :  { %1173 = shalt.err (!%p1170_p4)
}
 0x13f   :  { %s1174_s23 = scalar_lea.hbm %s1526_s3, 32 }
 0x140   :  { %p1175_p5 = scmp.ne.s32.totalorder %s1526_s3, %s1174_s23  ;;  %p1178_p6 = scmp.lt.u32.totalorder %s1174_s23, %s1526_s3 }
 0x142   :  { %p1180_p7 = pnand %p1178_p6, %p1175_p5 }
 0x144   :  { %1183 = shalt.err (!%p1180_p7)
}
 0x145   :  { %687 = dma.vmem_to_hbm [thread:$0]  %s685_s20, 32, %s1526_s3, [#allocation4]  }
 0x146   :  { %1184 = dma.done.wait [#allocation4], 32  }
 0x147   :  { %1185 = vsyncadd [#allocation4], 4294967264 }
 0x148   :  { %691 = vsyncpa [#allocation4], 1 }

</bundles_post_ra>
